<compile_context>
chip_gen: v7x
topology: tpu7x:2x2x1
jax: 0.10.0
libtpu: 0.0.40
codegen_flags: <defaults>
</compile_context>

<pallas_src>
import jax
import jax.numpy as jnp
from jax import lax
from jax.experimental import pallas as pl
from jax.experimental.pallas import tpu as pltpu

BN_EPS = 1e-3                        # nn.BatchNorm1d(eps=0.001)
VMEM_LIMIT_BYTES = 48 * 1024 * 1024  # fits v7x's 64 MiB VMEM; v5e/v6e have 128 MiB


def _make_subblock_kernel(*, K, dilation, C_in, T_tile, T_win, halo_left,
                          halo_right, halo_blk, fold_taps, has_left, has_right,
                          has_residual, compute_dtype):
    def kernel(lens_ref, *refs):
        refs = list(refs)
        xl_ref = refs.pop(0) if has_left else None
        xc_ref = refs.pop(0)
        xr_ref = refs.pop(0) if has_right else None
        w_ref = refs.pop(0)
        scale_ref = refs.pop(0)
        shift_ref = refs.pop(0)
        res_ref = refs.pop(0) if has_residual else None
        o_ref = refs.pop(0)
        xw_ref = refs.pop(0)                     # VMEM scratch (C_in, T_win)

        b = pl.program_id(0)
        t = pl.program_id(2)
        length = lens_ref[b]                     # per-utterance input length (SMEM)

        # ---- assemble the haloed input window (C_in, T_win), compute dtype ----
        pieces = []
        if has_left:
            pieces.append(xl_ref[0][:, halo_blk - halo_left:])
        pieces.append(xc_ref[0])
        if has_right:
            pieces.append(xr_ref[0][:, :halo_right])
        window = pieces[0] if len(pieces) == 1 else jnp.concatenate(pieces, axis=1)
        xw_ref[...] = window.astype(compute_dtype)

        # ---- MaskConv1d mask: only on tiles that touch a sequence boundary ----
        w_start = t * T_tile - halo_left         # global input coord of window col 0
        need_mask = jnp.logical_or(w_start < 0, w_start + T_win > length)

        @pl.when(need_mask)
        def _():
            g = w_start + lax.broadcasted_iota(jnp.int32, (C_in, T_win), 1)
            valid = jnp.logical_and(g >= 0, g < length)
            xw = xw_ref[...]
            xw_ref[...] = jnp.where(valid, xw, jnp.zeros_like(xw))

        xw = xw_ref[...]

        # ---- Conv1d on the MXU, f32 accumulation ----
        if fold_taps:
            taps = [xw[:, k * dilation:k * dilation + T_tile] for k in range(K)]
            xf = taps[0] if K == 1 else jnp.concatenate(taps, axis=0)
            acc = jnp.dot(w_ref[...], xf, preferred_element_type=jnp.float32)
        else:
            acc = jnp.dot(w_ref[0], xw[:, :T_tile],
                          preferred_element_type=jnp.float32)
            for k in range(1, K):
                acc = acc + jnp.dot(w_ref[k],
                                    xw[:, k * dilation:k * dilation + T_tile],
                                    preferred_element_type=jnp.float32)

        # ---- fused conv-bias + BatchNorm(running stats) + residual + ReLU (f32) ----
        y = acc * scale_ref[...] + shift_ref[...]
        if has_residual:
            y = y + res_ref[0].astype(jnp.float32)
        y = jnp.maximum(y, 0.0)
        # TODO(synk): dropout is identity (inference); BatchNorm uses running stats.
        o_ref[0] = y.astype(o_ref.dtype)

    return kernel


def _subblock_impl(x, t_logical, lengths, params, *, kernel_size, stride, dilation,
                   padding, residual, out_dtype, compute_dtype, max_t_tile,
                   max_cout_tile, single_buffer_consts):
    assert stride == 1, "kernel implements stride=1 ('same'-padded Jasper blocks)"
    K, d, p = kernel_size, dilation, padding
    assert 2 * p >= d * (K - 1), "requires at-least-'same' padding (JasperBlock default)"

    B, C_in, t_phys = x.shape
    w, conv_bias, gamma, beta, r_mean, r_var = params
    C_out = w.shape[0]

    halo_left = p
    halo_right = d * (K - 1) - p
    t_out = t_logical + 2 * p - d * (K - 1)

    # ---- tile selection (tuning knobs: 128-aligned for v5e, 256 for v6e/v7x) ----
    if t_out <= max_t_tile:
        T_tile, nt = t_out, 1
    else:
        assert max_t_tile % 128 == 0
        T_tile = max_t_tile
        nt = pl.cdiv(t_out, T_tile)
    T_al = nt * T_tile                       # tile-aligned (lane-dense) output length
    T_win = T_tile + d * (K - 1)

    if C_out <= max_cout_tile:
        C_out_tile = C_out
    else:
        C_out_tile = max_cout_tile
        while C_out_tile > 0 and C_out % C_out_tile != 0:
            C_out_tile -= 128
        if C_out_tile <= 0:
            C_out_tile = C_out
    n_co = C_out // C_out_tile

    # Halo block: small (128-aligned when possible) block used to stream the conv
    # halo without materializing a padded copy of the activation in HBM.
    max_halo = max(halo_left, halo_right, 1)
    assert max_halo <= T_tile
    halo_blk = T_tile
    for cand in range(128, T_tile, 128):
        if cand >= max_halo and T_tile % cand == 0:
            halo_blk = cand
            break
    r = T_tile // halo_blk
    n_halo = T_al // halo_blk
    has_left = halo_left > 0
    has_right = halo_right > 0
    has_residual = residual is not None
    fold_taps = (K * C_in) <= 4096           # fold taps into one long contraction

    # ---- align physical time extent to T_al (no per-sub-block 'same' padding) ----
    if t_phys < T_al:
        x = jnp.pad(x, ((0, 0), (0, 0), (0, T_al - t_phys)))
    elif t_phys > T_al:
        x = x[:, :, :T_al]
    if has_residual:
        t_res = residual.shape[2]
        if t_res < T_al:
            residual = jnp.pad(residual, ((0, 0), (0, 0), (0, T_al - t_res)))
        elif t_res > T_al:
            residual = residual[:, :, :T_al]

    # ---- fold conv bias + BatchNorm (running stats) into per-channel affine ----
    scale = (gamma / jnp.sqrt(r_var + BN_EPS)).astype(jnp.float32)
    shift = (beta + (conv_bias - r_mean) * scale).astype(jnp.float32)
    scale2, shift2 = scale[:, None], shift[:, None]

    if fold_taps:   # (C_out, K*C_in): operand rows are ordered tap-major
        w_arg = jnp.transpose(w, (0, 2, 1)).reshape(C_out, K * C_in).astype(compute_dtype)
        w_spec_shape = (C_out_tile, K * C_in)
        w_index_map = lambda b, co, t, lens: (co, 0)
    else:           # (K, C_out, C_in)
        w_arg = jnp.transpose(w, (2, 0, 1)).astype(compute_dtype)
        w_spec_shape = (K, C_out_tile, C_in)
        w_index_map = lambda b, co, t, lens: (0, co, 0)

    const_kw = {"pipeline_mode": pl.Buffered(1)} if single_buffer_consts else {}

    in_specs, args = [], []
    if has_left:
        in_specs.append(pl.BlockSpec(
            (1, C_in, halo_blk),
            lambda b, co, t, lens: (b, 0, jnp.maximum(t * r - 1, 0))))
        args.append(x)
    in_specs.append(pl.BlockSpec((1, C_in, T_tile),
                                 lambda b, co, t, lens: (b, 0, t)))
    args.append(x)
    if has_right:
        in_specs.append(pl.BlockSpec(
            (1, C_in, halo_blk),
            lambda b, co, t, lens: (b, 0, jnp.minimum((t + 1) * r, n_halo - 1))))
        args.append(x)
    in_specs.append(pl.BlockSpec(w_spec_shape, w_index_map, **const_kw))
    args.append(w_arg)
    in_specs.append(pl.BlockSpec((C_out_tile, 1),
                                 lambda b, co, t, lens: (co, 0), **const_kw))
    args.append(scale2)
    in_specs.append(pl.BlockSpec((C_out_tile, 1),
                                 lambda b, co, t, lens: (co, 0), **const_kw))
    args.append(shift2)
    if has_residual:
        in_specs.append(pl.BlockSpec((1, C_out_tile, T_tile),
                                     lambda b, co, t, lens: (b, co, t)))
        args.append(residual)     # streamed in native dtype, upcast in-kernel

    kernel = _make_subblock_kernel(
        K=K, dilation=d, C_in=C_in, T_tile=T_tile, T_win=T_win,
        halo_left=halo_left, halo_right=halo_right, halo_blk=halo_blk,
        fold_taps=fold_taps, has_left=has_left, has_right=has_right,
        has_residual=has_residual, compute_dtype=compute_dtype)

    out = pl.pallas_call(
        kernel,
        out_shape=jax.ShapeDtypeStruct((B, C_out, T_al), out_dtype),
        grid_spec=pltpu.PrefetchScalarGridSpec(
            num_scalar_prefetch=1,
            grid=(B, n_co, nt),
            in_specs=in_specs,
            out_specs=pl.BlockSpec((1, C_out_tile, T_tile),
                                   lambda b, co, t, lens: (b, co, t)),
            scratch_shapes=[pltpu.VMEM((C_in, T_win), compute_dtype)]),
        compiler_params=pltpu.CompilerParams(
            dimension_semantics=("parallel", "parallel", "parallel"),
            vmem_limit_bytes=VMEM_LIMIT_BYTES),
    )(lengths, *args)

    out_lengths = (lengths + 2 * p - d * (K - 1) - 1) // stride + 1
    return out, t_out, out_lengths


def jasper_subblock_forward(x, lengths, params, *, kernel_size, stride=1, dilation=1,
                            padding=0, residual=None, t_logical=None, out_dtype=None,
                            compute_dtype=jnp.bfloat16, max_t_tile=512,
                            max_cout_tile=256):
    """One JasperSubBlock. Returns (out[B,C_out,T_aligned], logical_T_out, out_lengths)."""
    if t_logical is None:
        t_logical = x.shape[2]
    if out_dtype is None:
        out_dtype = x.dtype
    lengths = lengths.astype(jnp.int32)
    kwargs = dict(kernel_size=kernel_size, stride=stride, dilation=dilation,
                  padding=padding, residual=residual, out_dtype=out_dtype,
                  compute_dtype=compute_dtype, max_t_tile=max_t_tile,
                  max_cout_tile=max_cout_tile)
    try:
        return _subblock_impl(x, t_logical, lengths, params,
                              single_buffer_consts=True, **kwargs)
    except Exception:
        # pl.Buffered(1) (single-buffered grid-invariant operands) may be
        # unsupported in some Pallas versions; fall back to default buffering.
        return _subblock_impl(x, t_logical, lengths, params,
                              single_buffer_consts=False, **kwargs)


def jasper_block_forward(x, lengths, residual, params, *, kernel_size, stride=1,
                         dilation=1, padding=0, compute_dtype=jnp.bfloat16,
                         max_t_tile=512, max_cout_tile=256):
    # TODO(synk): all R sub-blocks could be fused into one pallas_call (intermediates
    # held in VMEM with an R*(K-1)*dilation halo) for maximal HBM savings; here each
    # sub-block is one fused kernel with bf16 intermediates in HBM.
    final_dtype = x.dtype
    lengths = lengths.astype(jnp.int32)
    t_logical = x.shape[2]
    common = dict(kernel_size=kernel_size, stride=stride, dilation=dilation,
                  padding=padding, compute_dtype=compute_dtype,
                  max_t_tile=max_t_tile, max_cout_tile=max_cout_tile)
    h = x
    for p_sub in params[:-1]:
        # Intermediate activations are stored in the compute dtype (bf16): identical
        # numerics to casting at the next conv input, half the HBM traffic.
        h, t_logical, lengths = jasper_subblock_forward(
            h, lengths, p_sub, residual=None, t_logical=t_logical,
            out_dtype=compute_dtype, **common)
    out, t_logical, lengths = jasper_subblock_forward(
        h, lengths, params[-1], residual=residual, t_logical=t_logical,
        out_dtype=final_dtype, **common)
    if out.shape[2] != t_logical:
        out = out[:, :, :t_logical]
    return out, lengths


def init_jasper_block_params(key, num_sub_blocks, in_channels, out_channels, kernel_size):
    params = []
    for i in range(num_sub_blocks):
        cin = in_channels if i == 0 else out_channels
        key, k1, k2, k3, k4, k5, k6 = jax.random.split(key, 7)
        w = 0.1 * jax.random.normal(k1, (out_channels, cin, kernel_size), jnp.float32)
        b = 0.1 * jax.random.normal(k2, (out_channels,), jnp.float32)  # conv bias (bias=True)
        gamma = 1.0 + 0.1 * jax.random.normal(k3, (out_channels,), jnp.float32)
        beta = 0.1 * jax.random.normal(k4, (out_channels,), jnp.float32)
        r_mean = 0.1 * jax.random.normal(k5, (out_channels,), jnp.float32)
        r_var = 0.5 + 0.5 * jnp.abs(jax.random.normal(k6, (out_channels,), jnp.float32))
        params.append((w, b, gamma, beta, r_mean, r_var))
    return params


def jasper_block_reference(x, lengths, residual, params, *, kernel_size, stride,
                           dilation, padding, conv_input_dtype=jnp.float32):
    """Pure-JAX reference (lax.conv). conv_input_dtype mirrors the kernel's MXU dtype."""
    K, d, p = kernel_size, dilation, padding

    def subblock(x, lengths, pr, res):
        w, b, gamma, beta, rm, rv = pr
        T = x.shape[2]
        mask = jnp.arange(T)[None, :] < lengths[:, None]
        xm = x * mask[:, None, :].astype(x.dtype)
        y = lax.conv_general_dilated(
            xm.astype(conv_input_dtype), w.astype(conv_input_dtype),
            window_strides=(stride,), padding=[(p, p)], rhs_dilation=(d,),
            dimension_numbers=('NCH', 'OIH', 'NCH'),
            preferred_element_type=jnp.float32)
        y = y + b[None, :, None]
        y = (y - rm[None, :, None]) / jnp.sqrt(rv[None, :, None] + BN_EPS) \
            * gamma[None, :, None] + beta[None, :, None]
        if res is not None:
            y = y + res.astype(jnp.float32)
        y = jnp.maximum(y, 0.0)
        new_len = (lengths + 2 * p - d * (K - 1) - 1) // stride + 1
        return y, new_len

    for pr in params[:-1]:
        x, lengths = subblock(x, lengths, pr, None)
    return subblock(x, lengths, params[-1], residual)


if __name__ == "__main__":
    B, C_in, C_out, T = 2, 4, 8, 16
    num_sub_blocks, K, stride, dilation = 2, 3, 1, 1
    padding = (K // 2) * dilation                 # JasperBlock.get_same_padding

    key = jax.random.PRNGKey(0)
    key, kx, kr = jax.random.split(key, 3)
    x = jax.random.normal(kx, (B, C_in, T), jnp.float32)
    lengths = jnp.array([16, 11], jnp.int32)
    residual = jax.random.normal(kr, (B, C_out, T), jnp.float32)

    params = init_jasper_block_params(jax.random.PRNGKey(42),
                                      num_sub_blocks, C_in, C_out, K)

    # ---- f32 compute path: structural check against the pure-f32 reference ----
    out32, lens32 = jasper_block_forward(
        x, lengths, residual, params, kernel_size=K, stride=stride,
        dilation=dilation, padding=padding, compute_dtype=jnp.float32)
    out32 = jax.block_until_ready(out32)
    ref32, ref_lens = jasper_block_reference(
        x, lengths, residual, params, kernel_size=K, stride=stride,
        dilation=dilation, padding=padding, conv_input_dtype=jnp.float32)
    assert out32.shape == (B, C_out, T)
    assert jnp.allclose(out32, ref32, atol=1e-3, rtol=1e-3), \
        f"f32 max err {jnp.max(jnp.abs(out32 - ref32))}"
    assert jnp.array_equal(lens32, ref_lens)

    # ---- bf16 MXU streaming path vs a reference with matching operand casts ----
    outbf, lensbf = jasper_block_forward(
        x, lengths, residual, params, kernel_size=K, stride=stride,
        dilation=dilation, padding=padding, compute_dtype=jnp.bfloat16)
    outbf = jax.block_until_ready(outbf)
    refbf, _ = jasper_block_reference(
        x, lengths, residual, params, kernel_size=K, stride=stride,
        dilation=dilation, padding=padding, conv_input_dtype=jnp.bfloat16)
    assert outbf.dtype == x.dtype
    assert jnp.allclose(outbf, refbf, atol=1e-2, rtol=1e-2), \
        f"bf16 max err {jnp.max(jnp.abs(outbf - refbf))}"
    assert jnp.array_equal(lensbf, ref_lens)

    print("KERNEL_OK")
</pallas_src>

<mosaic_0001>
module attributes {stable_mosaic.version = 11 : i64} {
  func.func @kernel(%arg0: i32, %arg1: i32, %arg2: i32, %arg3: memref<2xi32, #tpu.memory_space<smem>>, %arg4: memref<1x4x16xf32, #tpu.memory_space<vmem>>, %arg5: memref<1x4x16xf32, #tpu.memory_space<vmem>>, %arg6: memref<1x4x16xf32, #tpu.memory_space<vmem>>, %arg7: memref<8x12xf32, #tpu.memory_space<vmem>>, %arg8: memref<8x1xf32, #tpu.memory_space<vmem>>, %arg9: memref<8x1xf32, #tpu.memory_space<vmem>>, %arg10: memref<1x8x16xf32, #tpu.memory_space<vmem>>, %arg11: memref<4x18xf32, #tpu.memory_space<vmem>>) attributes {dimension_semantics = [#tpu.dimension_semantics<parallel>, #tpu.dimension_semantics<parallel>, #tpu.dimension_semantics<parallel>], iteration_bounds = array<i64: 2, 1, 1>, scalar_prefetch = 1 : i64, scratch_operands = 1 : i64, tpu.core_type = #tpu.core_type<tc>, window_params = [{transform_indices = @transform_0, window_bounds = array<i64: 1, 4, 16>}, {transform_indices = @transform_1, window_bounds = array<i64: 1, 4, 16>}, {transform_indices = @transform_2, window_bounds = array<i64: 1, 4, 16>}, {pipeline_mode = #tpu.pipeline_mode<synchronous>, transform_indices = @transform_3, window_bounds = array<i64: 8, 12>}, {pipeline_mode = #tpu.pipeline_mode<synchronous>, transform_indices = @transform_4, window_bounds = array<i64: 8, 1>}, {pipeline_mode = #tpu.pipeline_mode<synchronous>, transform_indices = @transform_5, window_bounds = array<i64: 8, 1>}, {transform_indices = @transform_6, window_bounds = array<i64: 1, 8, 16>}]} {
    %0 = arith.index_cast %arg0 : i32 to index
    %1 = memref.load %arg3[%0] : memref<2xi32, #tpu.memory_space<smem>>
    %c0 = arith.constant 0 : index
    %c0_0 = arith.constant 0 : index
    %c0_1 = arith.constant 0 : index
    %2 = vector.load %arg4[%c0, %c0_0, %c0_1] : memref<1x4x16xf32, #tpu.memory_space<vmem>>, vector<1x4x16xf32>
    %3 = vector.shape_cast %2 : vector<1x4x16xf32> to vector<4x16xf32>
    %4 = vector.extract_strided_slice %3 {offsets = [0, 15], sizes = [4, 1], strides = [1, 1]} : vector<4x16xf32> to vector<4x1xf32>
    %c0_2 = arith.constant 0 : index
    %c0_3 = arith.constant 0 : index
    %c0_4 = arith.constant 0 : index
    %5 = vector.load %arg5[%c0_2, %c0_3, %c0_4] : memref<1x4x16xf32, #tpu.memory_space<vmem>>, vector<1x4x16xf32>
    %6 = vector.shape_cast %5 : vector<1x4x16xf32> to vector<4x16xf32>
    %c0_5 = arith.constant 0 : index
    %c0_6 = arith.constant 0 : index
    %c0_7 = arith.constant 0 : index
    %7 = vector.load %arg6[%c0_5, %c0_6, %c0_7] : memref<1x4x16xf32, #tpu.memory_space<vmem>>, vector<1x4x16xf32>
    %8 = vector.shape_cast %7 : vector<1x4x16xf32> to vector<4x16xf32>
    %9 = vector.extract_strided_slice %8 {offsets = [0, 0], sizes = [4, 1], strides = [1, 1]} : vector<4x16xf32> to vector<4x1xf32>
    %10 = tpu.concatenate %4, %6, %9 in 1 : vector<4x1xf32>, vector<4x16xf32>, vector<4x1xf32> -> vector<4x18xf32>
    %c0_8 = arith.constant 0 : index
    %c0_9 = arith.constant 0 : index
    %11 = vector.load %arg11[%c0_8, %c0_9] : memref<4x18xf32, #tpu.memory_space<vmem>>, vector<4x18xf32>
    tpu.vector_store %arg11[%c0_8, %c0_9], %10 {strides = array<i32>} : memref<4x18xf32, #tpu.memory_space<vmem>>, vector<4x18xf32>,
    %c16_i32 = arith.constant 16 : i32
    %12 = arith.muli %arg2, %c16_i32 : i32
    %c1_i32 = arith.constant 1 : i32
    %13 = arith.subi %12, %c1_i32 : i32
    %c0_i32 = arith.constant 0 : i32
    %14 = arith.cmpi slt, %13, %c0_i32 : i32
    %c18_i32 = arith.constant 18 : i32
    %15 = arith.addi %13, %c18_i32 : i32
    %16 = arith.cmpi sgt, %15, %1 : i32
    %17 = arith.ori %14, %16 : i1
    %18 = arith.extui %17 : i1 to i32
    %c0_i32_10 = arith.constant 0 : i32
    %19 = arith.cmpi ne, %18, %c0_i32_10 : i32
    scf.if %19 {
      %38 = tpu.iota {dimensions = array<i32: 1>} : vector<4x18xi32>
      %39 = vector.broadcast %13 : i32 to vector<4x18xi32>
      %40 = arith.addi %39, %38 : vector<4x18xi32>
      %c0_i32_23 = arith.constant 0 : i32
      %41 = vector.broadcast %c0_i32_23 : i32 to vector<4x18xi32>
      %42 = arith.cmpi sge, %40, %41 : vector<4x18xi32>
      %43 = vector.broadcast %1 : i32 to vector<4x18xi32>
      %44 = arith.cmpi slt, %40, %43 : vector<4x18xi32>
      %45 = arith.andi %42, %44 : vector<4x18xi1>
      %c0_24 = arith.constant 0 : index
      %c0_25 = arith.constant 0 : index
      %46 = vector.load %arg11[%c0_24, %c0_25] : memref<4x18xf32, #tpu.memory_space<vmem>>, vector<4x18xf32>
      %cst_26 = arith.constant 0.000000e+00 : f32
      %47 = vector.broadcast %cst_26 : f32 to vector<4x18xf32>
      %48 = arith.select %45, %46, %47 : vector<4x18xi1>, vector<4x18xf32>
      %c0_27 = arith.constant 0 : index
      %c0_28 = arith.constant 0 : index
      %49 = vector.load %arg11[%c0_27, %c0_28] : memref<4x18xf32, #tpu.memory_space<vmem>>, vector<4x18xf32>
      tpu.vector_store %arg11[%c0_27, %c0_28], %48 {strides = array<i32>} : memref<4x18xf32, #tpu.memory_space<vmem>>, vector<4x18xf32>,
    } else {
    }
    %c0_11 = arith.constant 0 : index
    %c0_12 = arith.constant 0 : index
    %20 = vector.load %arg11[%c0_11, %c0_12] : memref<4x18xf32, #tpu.memory_space<vmem>>, vector<4x18xf32>
    %21 = vector.extract_strided_slice %20 {offsets = [0, 0], sizes = [4, 16], strides = [1, 1]} : vector<4x18xf32> to vector<4x16xf32>
    %22 = vector.extract_strided_slice %20 {offsets = [0, 1], sizes = [4, 16], strides = [1, 1]} : vector<4x18xf32> to vector<4x16xf32>
    %23 = vector.extract_strided_slice %20 {offsets = [0, 2], sizes = [4, 16], strides = [1, 1]} : vector<4x18xf32> to vector<4x16xf32>
    %24 = tpu.concatenate %21, %22, %23 in 0 : vector<4x16xf32>, vector<4x16xf32>, vector<4x16xf32> -> vector<12x16xf32>
    %c0_13 = arith.constant 0 : index
    %c0_14 = arith.constant 0 : index
    %25 = vector.load %arg7[%c0_13, %c0_14] : memref<8x12xf32, #tpu.memory_space<vmem>>, vector<8x12xf32>
    %cst = arith.constant dense<0.000000e+00> : vector<8x16xf32>
    %26 = tpu.matmul %25, %24, %cst {dimension_numbers = #tpu.dot_dimension_numbers<[1], [0], [0], [1], [0, 0, 1, 1], [], []>} : vector<8x12xf32>, vector<12x16xf32>, vector<8x16xf32> -> vector<8x16xf32>
    %c0_15 = arith.constant 0 : index
    %c0_16 = arith.constant 0 : index
    %27 = vector.load %arg8[%c0_15, %c0_16] : memref<8x1xf32, #tpu.memory_space<vmem>>, vector<8x1xf32>
    %28 = vector.broadcast %27 : vector<8x1xf32> to vector<8x16xf32>
    %29 = arith.mulf %26, %28 : vector<8x16xf32>
    %c0_17 = arith.constant 0 : index
    %c0_18 = arith.constant 0 : index
    %30 = vector.load %arg9[%c0_17, %c0_18] : memref<8x1xf32, #tpu.memory_space<vmem>>, vector<8x1xf32>
    %31 = vector.broadcast %30 : vector<8x1xf32> to vector<8x16xf32>
    %32 = arith.addf %29, %31 : vector<8x16xf32>
    %cst_19 = arith.constant 0.000000e+00 : f32
    %33 = vector.broadcast %cst_19 : f32 to vector<8x16xf32>
    %34 = arith.maximumf %32, %33 : vector<8x16xf32>
    %c0_20 = arith.constant 0 : index
    %c0_21 = arith.constant 0 : index
    %c0_22 = arith.constant 0 : index
    %35 = vector.load %arg10[%c0_20, %c0_21, %c0_22] : memref<1x8x16xf32, #tpu.memory_space<vmem>>, vector<1x8x16xf32>
    %36 = vector.shape_cast %35 : vector<1x8x16xf32> to vector<8x16xf32>
    %37 = vector.shape_cast %34 : vector<8x16xf32> to vector<1x8x16xf32>
    tpu.vector_store %arg10[%c0_20, %c0_21, %c0_22], %37 {strides = array<i32>} : memref<1x8x16xf32, #tpu.memory_space<vmem>>, vector<1x8x16xf32>,
    return
  }
  func.func @transform_0(%arg0: i32, %arg1: i32, %arg2: i32, %arg3: memref<2xi32, #tpu.memory_space<smem>>) -> (i32, i32, i32) {
    %c1_i32 = arith.constant 1 : i32
    %0 = arith.muli %arg2, %c1_i32 : i32
    %c1_i32_0 = arith.constant 1 : i32
    %1 = arith.subi %0, %c1_i32_0 : i32
    %c0_i32 = arith.constant 0 : i32
    %2 = arith.maxsi %1, %c0_i32 : i32
    %c0_i32_1 = arith.constant 0 : i32
    %c0_i32_2 = arith.constant 0 : i32
    return %arg0, %c0_i32_1, %2 : i32, i32, i32
  }
  func.func @transform_1(%arg0: i32, %arg1: i32, %arg2: i32, %arg3: memref<2xi32, #tpu.memory_space<smem>>) -> (i32, i32, i32) {
    %c0_i32 = arith.constant 0 : i32
    %c0_i32_0 = arith.constant 0 : i32
    return %arg0, %c0_i32, %arg2 : i32, i32, i32
  }
  func.func @transform_2(%arg0: i32, %arg1: i32, %arg2: i32, %arg3: memref<2xi32, #tpu.memory_space<smem>>) -> (i32, i32, i32) {
    %c1_i32 = arith.constant 1 : i32
    %0 = arith.addi %arg2, %c1_i32 : i32
    %c1_i32_0 = arith.constant 1 : i32
    %1 = arith.muli %0, %c1_i32_0 : i32
    %c0_i32 = arith.constant 0 : i32
    %2 = arith.minsi %1, %c0_i32 : i32
    %c0_i32_1 = arith.constant 0 : i32
    %c0_i32_2 = arith.constant 0 : i32
    return %arg0, %c0_i32_1, %2 : i32, i32, i32
  }
  func.func @transform_3(%arg0: i32, %arg1: i32, %arg2: i32, %arg3: memref<2xi32, #tpu.memory_space<smem>>) -> (i32, i32) {
    %c0_i32 = arith.constant 0 : i32
    %c0_i32_0 = arith.constant 0 : i32
    return %arg1, %c0_i32 : i32, i32
  }
  func.func @transform_4(%arg0: i32, %arg1: i32, %arg2: i32, %arg3: memref<2xi32, #tpu.memory_space<smem>>) -> (i32, i32) {
    %c0_i32 = arith.constant 0 : i32
    %c0_i32_0 = arith.constant 0 : i32
    return %arg1, %c0_i32 : i32, i32
  }
  func.func @transform_5(%arg0: i32, %arg1: i32, %arg2: i32, %arg3: memref<2xi32, #tpu.memory_space<smem>>) -> (i32, i32) {
    %c0_i32 = arith.constant 0 : i32
    %c0_i32_0 = arith.constant 0 : i32
    return %arg1, %c0_i32 : i32, i32
  }
  func.func @transform_6(%arg0: i32, %arg1: i32, %arg2: i32, %arg3: memref<2xi32, #tpu.memory_space<smem>>) -> (i32, i32, i32) {
    %c0_i32 = arith.constant 0 : i32
    return %arg0, %arg1, %arg2 : i32, i32, i32
  }
}

module attributes {stable_mosaic.version = 11 : i64} {
  func.func @kernel(%arg0: i32, %arg1: i32, %arg2: i32, %arg3: memref<2xi32, #tpu.memory_space<smem>>, %arg4: memref<1x4x16xf32, #tpu.memory_space<vmem>>, %arg5: memref<1x4x16xf32, #tpu.memory_space<vmem>>, %arg6: memref<1x4x16xf32, #tpu.memory_space<vmem>>, %arg7: memref<8x12xf32, #tpu.memory_space<vmem>>, %arg8: memref<8x1xf32, #tpu.memory_space<vmem>>, %arg9: memref<8x1xf32, #tpu.memory_space<vmem>>, %arg10: memref<1x8x16xf32, #tpu.memory_space<vmem>>, %arg11: memref<4x18xf32, #tpu.memory_space<vmem>>) attributes {dimension_semantics = [#tpu.dimension_semantics<parallel>, #tpu.dimension_semantics<parallel>, #tpu.dimension_semantics<parallel>], iteration_bounds = array<i64: 2, 1, 1>, scalar_prefetch = 1 : i64, scratch_operands = 1 : i64, tpu.core_type = #tpu.core_type<tc>, window_params = [{transform_indices = @transform_0, window_bounds = array<i64: 1, 4, 16>}, {transform_indices = @transform_1, window_bounds = array<i64: 1, 4, 16>}, {transform_indices = @transform_2, window_bounds = array<i64: 1, 4, 16>}, {transform_indices = @transform_3, window_bounds = array<i64: 8, 12>}, {transform_indices = @transform_4, window_bounds = array<i64: 8, 1>}, {transform_indices = @transform_5, window_bounds = array<i64: 8, 1>}, {transform_indices = @transform_6, window_bounds = array<i64: 1, 8, 16>}]} {
    %0 = arith.index_cast %arg0 : i32 to index
    %1 = memref.load %arg3[%0] : memref<2xi32, #tpu.memory_space<smem>>
    %c0 = arith.constant 0 : index
    %c0_0 = arith.constant 0 : index
    %c0_1 = arith.constant 0 : index
    %2 = vector.load %arg4[%c0, %c0_0, %c0_1] : memref<1x4x16xf32, #tpu.memory_space<vmem>>, vector<1x4x16xf32>
    %3 = vector.shape_cast %2 : vector<1x4x16xf32> to vector<4x16xf32>
    %4 = vector.extract_strided_slice %3 {offsets = [0, 15], sizes = [4, 1], strides = [1, 1]} : vector<4x16xf32> to vector<4x1xf32>
    %c0_2 = arith.constant 0 : index
    %c0_3 = arith.constant 0 : index
    %c0_4 = arith.constant 0 : index
    %5 = vector.load %arg5[%c0_2, %c0_3, %c0_4] : memref<1x4x16xf32, #tpu.memory_space<vmem>>, vector<1x4x16xf32>
    %6 = vector.shape_cast %5 : vector<1x4x16xf32> to vector<4x16xf32>
    %c0_5 = arith.constant 0 : index
    %c0_6 = arith.constant 0 : index
    %c0_7 = arith.constant 0 : index
    %7 = vector.load %arg6[%c0_5, %c0_6, %c0_7] : memref<1x4x16xf32, #tpu.memory_space<vmem>>, vector<1x4x16xf32>
    %8 = vector.shape_cast %7 : vector<1x4x16xf32> to vector<4x16xf32>
    %9 = vector.extract_strided_slice %8 {offsets = [0, 0], sizes = [4, 1], strides = [1, 1]} : vector<4x16xf32> to vector<4x1xf32>
    %10 = tpu.concatenate %4, %6, %9 in 1 : vector<4x1xf32>, vector<4x16xf32>, vector<4x1xf32> -> vector<4x18xf32>
    %c0_8 = arith.constant 0 : index
    %c0_9 = arith.constant 0 : index
    %11 = vector.load %arg11[%c0_8, %c0_9] : memref<4x18xf32, #tpu.memory_space<vmem>>, vector<4x18xf32>
    tpu.vector_store %arg11[%c0_8, %c0_9], %10 {strides = array<i32>} : memref<4x18xf32, #tpu.memory_space<vmem>>, vector<4x18xf32>,
    %c16_i32 = arith.constant 16 : i32
    %12 = arith.muli %arg2, %c16_i32 : i32
    %c1_i32 = arith.constant 1 : i32
    %13 = arith.subi %12, %c1_i32 : i32
    %c0_i32 = arith.constant 0 : i32
    %14 = arith.cmpi slt, %13, %c0_i32 : i32
    %c18_i32 = arith.constant 18 : i32
    %15 = arith.addi %13, %c18_i32 : i32
    %16 = arith.cmpi sgt, %15, %1 : i32
    %17 = arith.ori %14, %16 : i1
    %18 = arith.extui %17 : i1 to i32
    %c0_i32_10 = arith.constant 0 : i32
    %19 = arith.cmpi ne, %18, %c0_i32_10 : i32
    scf.if %19 {
      %38 = tpu.iota {dimensions = array<i32: 1>} : vector<4x18xi32>
      %39 = vector.broadcast %13 : i32 to vector<4x18xi32>
      %40 = arith.addi %39, %38 : vector<4x18xi32>
      %c0_i32_23 = arith.constant 0 : i32
      %41 = vector.broadcast %c0_i32_23 : i32 to vector<4x18xi32>
      %42 = arith.cmpi sge, %40, %41 : vector<4x18xi32>
      %43 = vector.broadcast %1 : i32 to vector<4x18xi32>
      %44 = arith.cmpi slt, %40, %43 : vector<4x18xi32>
      %45 = arith.andi %42, %44 : vector<4x18xi1>
      %c0_24 = arith.constant 0 : index
      %c0_25 = arith.constant 0 : index
      %46 = vector.load %arg11[%c0_24, %c0_25] : memref<4x18xf32, #tpu.memory_space<vmem>>, vector<4x18xf32>
      %cst_26 = arith.constant 0.000000e+00 : f32
      %47 = vector.broadcast %cst_26 : f32 to vector<4x18xf32>
      %48 = arith.select %45, %46, %47 : vector<4x18xi1>, vector<4x18xf32>
      %c0_27 = arith.constant 0 : index
      %c0_28 = arith.constant 0 : index
      %49 = vector.load %arg11[%c0_27, %c0_28] : memref<4x18xf32, #tpu.memory_space<vmem>>, vector<4x18xf32>
      tpu.vector_store %arg11[%c0_27, %c0_28], %48 {strides = array<i32>} : memref<4x18xf32, #tpu.memory_space<vmem>>, vector<4x18xf32>,
    } else {
    }
    %c0_11 = arith.constant 0 : index
    %c0_12 = arith.constant 0 : index
    %20 = vector.load %arg11[%c0_11, %c0_12] : memref<4x18xf32, #tpu.memory_space<vmem>>, vector<4x18xf32>
    %21 = vector.extract_strided_slice %20 {offsets = [0, 0], sizes = [4, 16], strides = [1, 1]} : vector<4x18xf32> to vector<4x16xf32>
    %22 = vector.extract_strided_slice %20 {offsets = [0, 1], sizes = [4, 16], strides = [1, 1]} : vector<4x18xf32> to vector<4x16xf32>
    %23 = vector.extract_strided_slice %20 {offsets = [0, 2], sizes = [4, 16], strides = [1, 1]} : vector<4x18xf32> to vector<4x16xf32>
    %24 = tpu.concatenate %21, %22, %23 in 0 : vector<4x16xf32>, vector<4x16xf32>, vector<4x16xf32> -> vector<12x16xf32>
    %c0_13 = arith.constant 0 : index
    %c0_14 = arith.constant 0 : index
    %25 = vector.load %arg7[%c0_13, %c0_14] : memref<8x12xf32, #tpu.memory_space<vmem>>, vector<8x12xf32>
    %cst = arith.constant dense<0.000000e+00> : vector<8x16xf32>
    %26 = tpu.matmul %25, %24, %cst {dimension_numbers = #tpu.dot_dimension_numbers<[1], [0], [0], [1], [0, 0, 1, 1], [], []>} : vector<8x12xf32>, vector<12x16xf32>, vector<8x16xf32> -> vector<8x16xf32>
    %c0_15 = arith.constant 0 : index
    %c0_16 = arith.constant 0 : index
    %27 = vector.load %arg8[%c0_15, %c0_16] : memref<8x1xf32, #tpu.memory_space<vmem>>, vector<8x1xf32>
    %28 = vector.broadcast %27 : vector<8x1xf32> to vector<8x16xf32>
    %29 = arith.mulf %26, %28 : vector<8x16xf32>
    %c0_17 = arith.constant 0 : index
    %c0_18 = arith.constant 0 : index
    %30 = vector.load %arg9[%c0_17, %c0_18] : memref<8x1xf32, #tpu.memory_space<vmem>>, vector<8x1xf32>
    %31 = vector.broadcast %30 : vector<8x1xf32> to vector<8x16xf32>
    %32 = arith.addf %29, %31 : vector<8x16xf32>
    %cst_19 = arith.constant 0.000000e+00 : f32
    %33 = vector.broadcast %cst_19 : f32 to vector<8x16xf32>
    %34 = arith.maximumf %32, %33 : vector<8x16xf32>
    %c0_20 = arith.constant 0 : index
    %c0_21 = arith.constant 0 : index
    %c0_22 = arith.constant 0 : index
    %35 = vector.load %arg10[%c0_20, %c0_21, %c0_22] : memref<1x8x16xf32, #tpu.memory_space<vmem>>, vector<1x8x16xf32>
    %36 = vector.shape_cast %35 : vector<1x8x16xf32> to vector<8x16xf32>
    %37 = vector.shape_cast %34 : vector<8x16xf32> to vector<1x8x16xf32>
    tpu.vector_store %arg10[%c0_20, %c0_21, %c0_22], %37 {strides = array<i32>} : memref<1x8x16xf32, #tpu.memory_space<vmem>>, vector<1x8x16xf32>,
    return
  }
  func.func @transform_0(%arg0: i32, %arg1: i32, %arg2: i32, %arg3: memref<2xi32, #tpu.memory_space<smem>>) -> (i32, i32, i32) {
    %c1_i32 = arith.constant 1 : i32
    %0 = arith.muli %arg2, %c1_i32 : i32
    %c1_i32_0 = arith.constant 1 : i32
    %1 = arith.subi %0, %c1_i32_0 : i32
    %c0_i32 = arith.constant 0 : i32
    %2 = arith.maxsi %1, %c0_i32 : i32
    %c0_i32_1 = arith.constant 0 : i32
    %c0_i32_2 = arith.constant 0 : i32
    return %arg0, %c0_i32_1, %2 : i32, i32, i32
  }
  func.func @transform_1(%arg0: i32, %arg1: i32, %arg2: i32, %arg3: memref<2xi32, #tpu.memory_space<smem>>) -> (i32, i32, i32) {
    %c0_i32 = arith.constant 0 : i32
    %c0_i32_0 = arith.constant 0 : i32
    return %arg0, %c0_i32, %arg2 : i32, i32, i32
  }
  func.func @transform_2(%arg0: i32, %arg1: i32, %arg2: i32, %arg3: memref<2xi32, #tpu.memory_space<smem>>) -> (i32, i32, i32) {
    %c1_i32 = arith.constant 1 : i32
    %0 = arith.addi %arg2, %c1_i32 : i32
    %c1_i32_0 = arith.constant 1 : i32
    %1 = arith.muli %0, %c1_i32_0 : i32
    %c0_i32 = arith.constant 0 : i32
    %2 = arith.minsi %1, %c0_i32 : i32
    %c0_i32_1 = arith.constant 0 : i32
    %c0_i32_2 = arith.constant 0 : i32
    return %arg0, %c0_i32_1, %2 : i32, i32, i32
  }
  func.func @transform_3(%arg0: i32, %arg1: i32, %arg2: i32, %arg3: memref<2xi32, #tpu.memory_space<smem>>) -> (i32, i32) {
    %c0_i32 = arith.constant 0 : i32
    %c0_i32_0 = arith.constant 0 : i32
    return %arg1, %c0_i32 : i32, i32
  }
  func.func @transform_4(%arg0: i32, %arg1: i32, %arg2: i32, %arg3: memref<2xi32, #tpu.memory_space<smem>>) -> (i32, i32) {
    %c0_i32 = arith.constant 0 : i32
    %c0_i32_0 = arith.constant 0 : i32
    return %arg1, %c0_i32 : i32, i32
  }
  func.func @transform_5(%arg0: i32, %arg1: i32, %arg2: i32, %arg3: memref<2xi32, #tpu.memory_space<smem>>) -> (i32, i32) {
    %c0_i32 = arith.constant 0 : i32
    %c0_i32_0 = arith.constant 0 : i32
    return %arg1, %c0_i32 : i32, i32
  }
  func.func @transform_6(%arg0: i32, %arg1: i32, %arg2: i32, %arg3: memref<2xi32, #tpu.memory_space<smem>>) -> (i32, i32, i32) {
    %c0_i32 = arith.constant 0 : i32
    return %arg0, %arg1, %arg2 : i32, i32, i32
  }
}

</mosaic_0001>

<bundles_post_ra>
// kernel: tpu_custom_call.1
= control target key start
LH: loop header
LB: loop body
LE: loop exit
PB: predicated region body
PF: predicated region fallthrough
CT: control target
= control target key end

     0   :  { %s1127_s0 = inlined_call_operand.vmem [shape: s32[2], index: 0, kind: input, shape index: {}]   ;;  %s1128_s1 = inlined_call_operand.vmem [shape: f32[2,4,16], index: 1, kind: input, shape index: {}]   ;;  %s1129_s2 = inlined_call_operand.vmem [shape: f32[2,4,16], index: 2, kind: input, shape index: {}]   ;;  %s1130_s3 = inlined_call_operand.vmem [shape: f32[2,4,16], index: 3, kind: input, shape index: {}]   ;;  %s1131_s4 = inlined_call_operand.vmem [shape: f32[8,12], index: 4, kind: input, shape index: {}]   ;;  %s1132_s5 = inlined_call_operand.vmem [shape: f32[8,1], index: 5, kind: input, shape index: {}]   ;;  %s1133_s6 = inlined_call_operand.vmem [shape: f32[8,1], index: 6, kind: input, shape index: {}]   ;;  %s1134_s7 = inlined_call_operand.hbm [shape: f32[2,8,16], index: 7, kind: output, shape index: {}]  }
   0x1   :  { %s12_s26 = sshll.u32 %s1127_s0, 4  ;;  %s13_s26 = int_to_ptr.vmem [resolvable:$true] %s12_s26 }
   0x2   :  { %s850_s27 = scalar_lea.vmem %s13_s26, 16  ;;  %p855_p1 = scmp.lt.s32.totalorder %s13_s26, %s13_s26 }
   0x3   :  { %p851_p0 = scmp.ne.s32.totalorder %s13_s26, %s850_s27  ;;  %p856_p2 = scmp.lt.s32.totalorder %s850_s27, %s850_s27 }
   0x5   :  { %p857_p3 = por %p856_p2, %p855_p1 }
   0x7   :  { %p858_p4 = pnand %p857_p3, %p851_p0 }
   0x9   :  { %861 = shalt.err (!%p858_p4)  }
   0xa   :  { %s944_s28 = smov [#allocation4]  }
   0xb   :  { %15 = dma.vmem_to_smem %s13_s26, 16, %s944_s28, [#allocation3] }
   0xc   :  { %914 = dma.done.wait [#allocation3], 16 }
   0xd   :  { %915 = vsyncadd [#allocation3], 4294967280 }
   0xe   :  { %17 = sfence }
   0xf   :  { %18 = vsyncpa [#allocation6], 0 }
  0x10   :  { %20 = vsyncpa [#allocation6 + $0x1], 0  ;;  %s999_s29 = smov 0   ;;  %s1001_s30 = smov 0  }
  0x11   :  { %s1003_s0 = smov 0   ;;  %s1005_s8 = smov 0  }
  0x12   :  { %s1007_s9 = smov 0   ;;  %s1009_s10 = smov 0  }
  0x13 LB: > { %s749_s11 = sadd.s32 4294967295, %s942_s10   ;;  %s750_s12 = sadd.s32 4294967294, %s942_s10   ;;  %s942_s10 = sphi %s1009_s10, %s26_s10   ;;  %s938_s9 = sphi %s1007_s9, %s1141_s9   ;;  %s934_s8 = sphi %s1005_s8, %s1140_s8   ;;  %s930_s0 = sphi %s1003_s0, %s1139_s0   ;;  %s926_s30 = sphi %s1001_s30, %s1138_s30   ;;  %s922_s29 = sphi %s999_s29, %s1137_s29  }
  0x14   : > { %s45_s13 = sadd.s32 1, %s938_s9  ;;  %s230_s14 = sadd.s32 1, %s930_s0 }
  0x15   : > { %p47_p5 = scmp.ge.s32.totalorder %s45_s13, 2  ;;  %p240_p6 = scmp.ne.s32.totalorder %s930_s0, %s926_s30 }
  0x16   : > { %p241_p7 = scmp.eq.s32.totalorder %s749_s11, 1  ;;  %p246_p8 = scmp.ne.s32.totalorder %s926_s30, %s922_s29 }
  0x17   : > { %s1143_s13 = smov (%p47_p5, %s45_s13), 0  ;;  %p247_p10 = scmp.eq.s32.totalorder %s750_s12, 1 }
  0x18   : > { %p1039_p9 = por %p241_p7, %p240_p6  ;;  %s223_s16 = ssub.s32 %s938_s9, %s1143_s13 }
  0x19   : > { %p756_p11 = scmp.ge.s32.totalorder %s942_s10, 1  ;;  %p228_p12 = scmp.eq.s32.totalorder %s223_s16, 0 }
  0x1a   : > { %p1046_p13 = por %p247_p10, %p246_p8  ;;  %p328_p0 = scmp.lt.s32.totalorder %s942_s10, 3 }
  0x1b   : > { %s1052_s18 = scalar_select %p228_p12, %s930_s0, %s230_s14  }
  0x1c   : > { %p329_p1 = pnand %p756_p11, %p328_p0 }
  0x1d   : > { %p395_p2 = scmp.lt.s32.totalorder (!%p329_p1), %s934_s8, 1  ;;  %s945_s12 = smov (!%p329_p1), 113   ;;  %v468_v3 = vlaneseq (!%p329_p1)  ;;  %vm453_vm0 = vcmask (!%p329_p1), 7168   ;;  %vm455_vm1 = vcmask (!%p329_p1), 138240   ;;  %vm457_vm2 = vcmask (!%p329_p1), 142336   ;;  %v573_v19 = vld [vmem:[%s1133_s6] sm:$0xff] (!%p329_p1) }
  0x1e   : > { %332 = sbr.rel (%p329_p1) target bundleno = 535 (0x217), region = 44  ;;  %s946_s14 = smov (!%p329_p1), 17   ;;  %v948_v14 = vmov (!%p329_p1), 0.0|0.0   ;;  %vm949_vm6 = vmmov (!%p329_p1), 0   ;;  %v950_v15 = vmov (!%p329_p1), 0.0   ;;  %v951_v16 = vmov (!%p329_p1), 0  }
  0x1f   : > { %s947_s16 = smov (!%p329_p1), 1   ;;  %v469_v5 = vand.u32 (!%p329_p1), 127, %v468_v3  ;;  %778 = vmatprep.subr.bf16.mxu0 (!%p329_p1), %v948_v14  ;;  %775 = vmatprep.mubr.msk.f32.mxu0 (!%p329_p1), %vm949_vm6, %v950_v15  ;;  %v566_v20 = vld [vmem:[%s1132_s5] sm:$0xff] (!%p329_p1)  ;;  %vm487_vm7 = vcmask (!%p329_p1), 1043456   ;;  %vm954_vm8 = vmmov (!%p329_p1), 1   ;;  %vm490_vm10 = vcmask (!%p329_p1), 97280  }
  0x20   : > { %848 = vset.pattern.permute.xlu1 (!%p329_p1), %v951_v16  ;;  %849 = vset.pattern.permute.xlu0 (!%p329_p1), %v951_v16  ;;  %vm780_vm9 = vmpackc.low (!%p329_p1), %vm487_vm7, %vm954_vm8  ;;  %v489_v25 = vld [vmem:[%s1131_s4] sm:$0xff] (!%p329_p1)  ;;  %s389_s28 = sand.u32 (!%p329_p1), 1, %s926_s30   ;;  %vm581_vm11 = vcmask (!%p329_p1), 130048  }
  0x21   : > { %v471_v9 = vadd.s32 (!%p329_p1), 4294967295, %v469_v5  ;;  %s584_s22 = scalar_lea.sflag (!%p329_p1), [#allocation6], %s389_s28 }
  0x23   : > { %vm472_vm3 = vcmp.ge.s32.totalorder (!%p329_p1), %v471_v9, 0 }
  0x25   : > { %s396_s19 = scalar_select %p395_p2, %s934_s8, 1 }
  0x27   : > { %s758_s20 = sshll.u32 %s396_s19, 2  ;;  %s437_s19 = sld [smem:[#allocation4 + %s934_s8]] }
  0x28   : > { %s401_s23 = scalar_lea.vmem %s1128_s1, %s758_s20  ;;  %s411_s26 = scalar_lea.vmem %s1129_s2, %s758_s20 }
  0x29   : > { %v438_v0 = vld [vmem:[%s401_s23] sm:$0xf]  ;;  %s421_s11 = scalar_lea.vmem %s1130_s3, %s758_s20  ;;  %s952_s20 = smov 126  }
  0x2a   : > { %442 = vrot.lane.b32.xlu0 %v438_v0, %s945_s12  ;;  %v440_v1 = vld [vmem:[%s421_s11] sm:$0xf]  ;;  %s953_s23 = smov 127   ;;  %s757_s11 = sshll.u32 %s389_s28, 3 }
  0x2b   : > { %v439_v2 = vld [vmem:[%s411_s26] sm:$0xf]  ;;  %450 = vrot.lane.b32.xlu1 %v440_v1, %s946_s14  ;;  %s765_s12 = sshll.u32 %s934_s8, 7  ;;  %s391_s14 = scalar_lea.vmem [#allocation5], %s757_s11 }
  0x2c   : > { %s1080_s21 = scalar_lea.hbm %s1134_s7, %s765_s12  ;;  %s955_s8 = smov [#allocation5]  }
  0x2d   : > { %v473_v10 = vstv %s437_s19  ;;  %s866_s24 = sshll.u32 %s955_s8, 4  ;;  %s867_s24 = int_to_ptr.vmem [resolvable:$false] %s866_s24 }
  0x2e   : > { %446 = vrot.lane.b32.xlu0 %v439_v2, %s947_s16  ;;  %vm474_vm4 = vcmp.lt.s32.totalorder %v471_v9, %v473_v10  ;;  %s599_s16 = sshll.u32 %s391_s14, 4  ;;  %s868_s25 = scalar_lea.vmem %s867_s24, 256  ;;  %s1082_s16 = int_to_ptr.vmem [resolvable:$true] %s599_s16 }
  0x2f   : > { %vm475_vm5 = vmand %vm472_vm3, %vm474_vm4  ;;  %p869_p6 = scmp.lt.s32.totalorder %s1082_s16, %s867_s24 }
  0x9c   : > { %v443_v4 = vpop.permute.xlu0 %442 }
  0x9d   : > { %v451_v6 = vpop.permute.xlu1 %450 }
  0xa0   : > { %v447_v7 = vpop.permute.xlu0 %446 }
  0xa1   : > { %v454_v8 = vsel %vm453_vm0, %v443_v4, %v447_v7 }
  0xa2   : > { %v456_v11 = vsel %vm455_vm1, %v454_v8, %v451_v6 }
  0xa3   : > { %458 = vst.msk [vmem:[#allocation2] sm:$0xf] %vm457_vm2, %v456_v11 }
  0xaa   : > { %v476_v12 = vld [vmem:[#allocation2] sm:$0xf] }
  0xab   : > { %v477_v13 = vsel %vm475_vm5, %v476_v12, 0.0 }
  0xac   : > { %478 = vst.msk [vmem:[#allocation2] sm:$0xf] %vm457_vm2, %v477_v13 }
  0xb3   : > { %v479_v17 = vld [vmem:[#allocation2] sm:$0xf] }
  0xb4   : > { %485 = vrot.lane.b32.xlu0 %v479_v17, %s952_s20  ;;  %v481_v18 = vrot.slane %v479_v17, 4 }
  0xb6   : > { %482 = vrot.lane.b32.xlu1 %v481_v18, %s953_s23  ;;  %s862_s23 = scalar_lea.vmem %s1082_s16, 128 }
  0xb7   : > { %p863_p3 = scmp.ne.s32.totalorder %s1082_s16, %s862_s23  ;;  %p870_p7 = scmp.lt.s32.totalorder %s868_s25, %s862_s23 }
  0xb8   : > { %576 = vperm.xlu0 %849, %v573_v19  }
  0xb9   : > { %p864_p4 = pnand %p863_p3, %p1039_p9  ;;  %p871_p8 = por %p870_p7, %p869_p6 }
  0xba   : > { %569 = vperm.xlu1 %848, %v566_v20  }
  0xbb   : > { %p865_p5 = pneg %p864_p4 }
  0xbd   : > { %p872_p10 = pnand %p871_p8, %p865_p5 }
 0x126   : > { %v486_v22 = vpop.permute.xlu0 %485 }
 0x128   : > { %v483_v21 = vpop.permute.xlu1 %482 }
 0x129   : > { %v488_v23 = vsel %vm487_vm7, %v479_v17, %v483_v21 }
 0x12a   : > { %v779_v24 = vpack.c.bf16 %v486_v22, %v488_v23 }
 0x12c   : > { %781 = vmatpush3.bf16.msk.msra.mxu0 %vm780_vm9, %v779_v24 }
 0x12f   : > { %776 = vmatmul.mubr.msk.f32.vlgmr.msra.gmra.mrb[0].mxu0 %vm490_vm10, %v489_v25 }
 0x137   : > { %v577_v28 = vpop.permute.xlu0 %576 }
 0x139   : > { %v570_v26 = vpop.permute.xlu1 %569 }
 0x202   : > { %v562_v27 = vpop.f32.mrb[0].mxu0 }
 0x203   : > { %v572_v29 = vmul.f32 %v570_v26, %v562_v27  ;;  %v777_v30 = vpop.f32.mrb[1].mxu0 }
 0x205   : > { %v579_v31 = vadd.f32 %v577_v28, %v572_v29 }
 0x207   : > { %v580_v32 = vmax.f32 %v579_v31, 0.0 }
 0x209   : > { %582 = vst.msk [vmem:[%s391_s14] sm:$0xff] %vm581_vm11, %v580_v32 }
 0x20a   : > { %875 = shalt.err (!%p872_p10)
}
 0x20b   : > { %s876_s26 = scalar_lea.hbm %s1080_s21, 128  ;;  %s880_s11 = scalar_lea.hbm %s1134_s7, 256 }
 0x20c   : > { %p877_p11 = scmp.ne.s32.totalorder %s1080_s21, %s876_s26  ;;  %p881_p1 = scmp.lt.u32.totalorder %s1080_s21, %s1134_s7 }
 0x20d   : > { %p882_p2 = scmp.lt.u32.totalorder %s880_s11, %s876_s26  ;;  %p884_p4 = scmp.lt.u32.totalorder %s876_s26, %s1080_s21 }
 0x20e   : > { %p878_p12 = pnand %p877_p11, %p1039_p9 }
 0x20f   : > { %p883_p3 = por %p882_p2, %p881_p1 }
 0x210   : > { %p879_p0 = pneg %p878_p12 }
 0x211   : > { %p885_p5 = por %p884_p4, %p883_p3 }
 0x213   : > { %p886_p6 = pnand %p885_p5, %p879_p0 }
 0x215   : > { %889 = shalt.err (!%p886_p6)
}
 0x216   : > { %782 = dma.vmem_to_hbm [thread:$0]  (%p1039_p9), %s1082_s16, 128, %s1080_s21, %s584_s22  }
 0x217 PF: > { %p788_p7 = scmp.ge.s32.totalorder %s942_s10, 2  ;;  %s611_s19 = sand.u32 1, %s922_s29  }
 0x218   : > { %s612_s20 = scalar_lea.sflag [#allocation6], %s611_s19 }
 0x219   : > { %p785_p8 = pnand %p788_p7, %p1046_p13 }
 0x21b   : > { %917 = dma.done.wait (!%p785_p8), %s612_s20, 128  }
 0x21c   : > { %919 = vsyncadd (!%p785_p8), %s612_s20, 4294967168  ;;  %s26_s10 = sadd.s32 1, %s942_s10   ;;  %s1137_s29 = smov %s926_s30 }
 0x21d   : > { %p23_p10 = scmp.ge.s32.totalorder %s26_s10, 4   ;;  %s1138_s30 = smov %s930_s0 }
 0x21e   : > { %s1139_s0 = smov %s1052_s18  ;;  %s1140_s8 = smov %s938_s9 }
 0x21f   : > { %s1141_s9 = smov %s1143_s13  ;;  %25 = sbr.rel (!%p23_p10) target bundleno = 19 (0x13), region = 98 }
 0x226   :  { %617 = vsyncpa [#allocation6], 1 }
 0x227   :  { %619 = vsyncpa [#allocation6 + $0x1], 1 }

// kernel: tpu_custom_call.1
= control target key start
LH: loop header
LB: loop body
LE: loop exit
PB: predicated region body
PF: predicated region fallthrough
CT: control target
= control target key end

     0   :  { %s1127_s0 = inlined_call_operand.vmem [shape: s32[2], index: 0, kind: input, shape index: {}]   ;;  %s1128_s1 = inlined_call_operand.vmem [shape: f32[2,4,16], index: 1, kind: input, shape index: {}]   ;;  %s1129_s2 = inlined_call_operand.vmem [shape: f32[2,4,16], index: 2, kind: input, shape index: {}]   ;;  %s1130_s3 = inlined_call_operand.vmem [shape: f32[2,4,16], index: 3, kind: input, shape index: {}]   ;;  %s1131_s4 = inlined_call_operand.vmem [shape: f32[8,12], index: 4, kind: input, shape index: {}]   ;;  %s1132_s5 = inlined_call_operand.vmem [shape: f32[8,1], index: 5, kind: input, shape index: {}]   ;;  %s1133_s6 = inlined_call_operand.vmem [shape: f32[8,1], index: 6, kind: input, shape index: {}]   ;;  %s1134_s7 = inlined_call_operand.hbm [shape: f32[2,8,16], index: 7, kind: output, shape index: {}]  }
   0x1   :  { %s12_s26 = sshll.u32 %s1127_s0, 4  ;;  %s13_s26 = int_to_ptr.vmem [resolvable:$true] %s12_s26 }
   0x2   :  { %s850_s27 = scalar_lea.vmem %s13_s26, 16  ;;  %p855_p1 = scmp.lt.s32.totalorder %s13_s26, %s13_s26 }
   0x3   :  { %p851_p0 = scmp.ne.s32.totalorder %s13_s26, %s850_s27  ;;  %p856_p2 = scmp.lt.s32.totalorder %s850_s27, %s850_s27 }
   0x5   :  { %p857_p3 = por %p856_p2, %p855_p1 }
   0x7   :  { %p858_p4 = pnand %p857_p3, %p851_p0 }
   0x9   :  { %861 = shalt.err (!%p858_p4)  }
   0xa   :  { %s944_s28 = smov [#allocation4]  }
   0xb   :  { %15 = dma.vmem_to_smem %s13_s26, 16, %s944_s28, [#allocation3] }
   0xc   :  { %914 = dma.done.wait [#allocation3], 16 }
   0xd   :  { %915 = vsyncadd [#allocation3], 4294967280 }
   0xe   :  { %17 = sfence }
   0xf   :  { %18 = vsyncpa [#allocation6], 0 }
  0x10   :  { %20 = vsyncpa [#allocation6 + $0x1], 0  ;;  %s999_s29 = smov 0   ;;  %s1001_s30 = smov 0  }
  0x11   :  { %s1003_s0 = smov 0   ;;  %s1005_s8 = smov 0  }
  0x12   :  { %s1007_s9 = smov 0   ;;  %s1009_s10 = smov 0  }
  0x13 LB: > { %s749_s11 = sadd.s32 4294967295, %s942_s10   ;;  %s750_s12 = sadd.s32 4294967294, %s942_s10   ;;  %s942_s10 = sphi %s1009_s10, %s26_s10   ;;  %s938_s9 = sphi %s1007_s9, %s1141_s9   ;;  %s934_s8 = sphi %s1005_s8, %s1140_s8   ;;  %s930_s0 = sphi %s1003_s0, %s1139_s0   ;;  %s926_s30 = sphi %s1001_s30, %s1138_s30   ;;  %s922_s29 = sphi %s999_s29, %s1137_s29  }
  0x14   : > { %s45_s13 = sadd.s32 1, %s938_s9  ;;  %s230_s14 = sadd.s32 1, %s930_s0 }
  0x15   : > { %p47_p5 = scmp.ge.s32.totalorder %s45_s13, 2  ;;  %p240_p6 = scmp.ne.s32.totalorder %s930_s0, %s926_s30 }
  0x16   : > { %p241_p7 = scmp.eq.s32.totalorder %s749_s11, 1  ;;  %p246_p8 = scmp.ne.s32.totalorder %s926_s30, %s922_s29 }
  0x17   : > { %s1143_s13 = smov (%p47_p5, %s45_s13), 0  ;;  %p247_p10 = scmp.eq.s32.totalorder %s750_s12, 1 }
  0x18   : > { %p1039_p9 = por %p241_p7, %p240_p6  ;;  %s223_s16 = ssub.s32 %s938_s9, %s1143_s13 }
  0x19   : > { %p756_p11 = scmp.ge.s32.totalorder %s942_s10, 1  ;;  %p228_p12 = scmp.eq.s32.totalorder %s223_s16, 0 }
  0x1a   : > { %p1046_p13 = por %p247_p10, %p246_p8  ;;  %p328_p0 = scmp.lt.s32.totalorder %s942_s10, 3 }
  0x1b   : > { %s1052_s18 = scalar_select %p228_p12, %s930_s0, %s230_s14  }
  0x1c   : > { %p329_p1 = pnand %p756_p11, %p328_p0 }
  0x1d   : > { %p395_p2 = scmp.lt.s32.totalorder (!%p329_p1), %s934_s8, 1  ;;  %s945_s12 = smov (!%p329_p1), 113   ;;  %v468_v3 = vlaneseq (!%p329_p1)  ;;  %vm453_vm0 = vcmask (!%p329_p1), 7168   ;;  %vm455_vm1 = vcmask (!%p329_p1), 138240   ;;  %vm457_vm2 = vcmask (!%p329_p1), 142336   ;;  %v573_v19 = vld [vmem:[%s1133_s6] sm:$0xff] (!%p329_p1) }
  0x1e   : > { %332 = sbr.rel (%p329_p1) target bundleno = 535 (0x217), region = 44  ;;  %s946_s14 = smov (!%p329_p1), 17   ;;  %v948_v14 = vmov (!%p329_p1), 0.0|0.0   ;;  %vm949_vm6 = vmmov (!%p329_p1), 0   ;;  %v950_v15 = vmov (!%p329_p1), 0.0   ;;  %v951_v16 = vmov (!%p329_p1), 0  }
  0x1f   : > { %s947_s16 = smov (!%p329_p1), 1   ;;  %v469_v5 = vand.u32 (!%p329_p1), 127, %v468_v3  ;;  %778 = vmatprep.subr.bf16.mxu0 (!%p329_p1), %v948_v14  ;;  %775 = vmatprep.mubr.msk.f32.mxu0 (!%p329_p1), %vm949_vm6, %v950_v15  ;;  %v566_v20 = vld [vmem:[%s1132_s5] sm:$0xff] (!%p329_p1)  ;;  %vm487_vm7 = vcmask (!%p329_p1), 1043456   ;;  %vm954_vm8 = vmmov (!%p329_p1), 1   ;;  %vm490_vm10 = vcmask (!%p329_p1), 97280  }
  0x20   : > { %848 = vset.pattern.permute.xlu1 (!%p329_p1), %v951_v16  ;;  %849 = vset.pattern.permute.xlu0 (!%p329_p1), %v951_v16  ;;  %vm780_vm9 = vmpackc.low (!%p329_p1), %vm487_vm7, %vm954_vm8  ;;  %v489_v25 = vld [vmem:[%s1131_s4] sm:$0xff] (!%p329_p1)  ;;  %s389_s28 = sand.u32 (!%p329_p1), 1, %s926_s30   ;;  %vm581_vm11 = vcmask (!%p329_p1), 130048  }
  0x21   : > { %v471_v9 = vadd.s32 (!%p329_p1), 4294967295, %v469_v5  ;;  %s584_s22 = scalar_lea.sflag (!%p329_p1), [#allocation6], %s389_s28 }
  0x23   : > { %vm472_vm3 = vcmp.ge.s32.totalorder (!%p329_p1), %v471_v9, 0 }
  0x25   : > { %s396_s19 = scalar_select %p395_p2, %s934_s8, 1 }
  0x27   : > { %s758_s20 = sshll.u32 %s396_s19, 2  ;;  %s437_s19 = sld [smem:[#allocation4 + %s934_s8]] }
  0x28   : > { %s401_s23 = scalar_lea.vmem %s1128_s1, %s758_s20  ;;  %s411_s26 = scalar_lea.vmem %s1129_s2, %s758_s20 }
  0x29   : > { %v438_v0 = vld [vmem:[%s401_s23] sm:$0xf]  ;;  %s421_s11 = scalar_lea.vmem %s1130_s3, %s758_s20  ;;  %s952_s20 = smov 126  }
  0x2a   : > { %442 = vrot.lane.b32.xlu0 %v438_v0, %s945_s12  ;;  %v440_v1 = vld [vmem:[%s421_s11] sm:$0xf]  ;;  %s953_s23 = smov 127   ;;  %s757_s11 = sshll.u32 %s389_s28, 3 }
  0x2b   : > { %v439_v2 = vld [vmem:[%s411_s26] sm:$0xf]  ;;  %450 = vrot.lane.b32.xlu1 %v440_v1, %s946_s14  ;;  %s765_s12 = sshll.u32 %s934_s8, 7  ;;  %s391_s14 = scalar_lea.vmem [#allocation5], %s757_s11 }
  0x2c   : > { %s1080_s21 = scalar_lea.hbm %s1134_s7, %s765_s12  ;;  %s955_s8 = smov [#allocation5]  }
  0x2d   : > { %v473_v10 = vstv %s437_s19  ;;  %s866_s24 = sshll.u32 %s955_s8, 4  ;;  %s867_s24 = int_to_ptr.vmem [resolvable:$false] %s866_s24 }
  0x2e   : > { %446 = vrot.lane.b32.xlu0 %v439_v2, %s947_s16  ;;  %vm474_vm4 = vcmp.lt.s32.totalorder %v471_v9, %v473_v10  ;;  %s599_s16 = sshll.u32 %s391_s14, 4  ;;  %s868_s25 = scalar_lea.vmem %s867_s24, 256  ;;  %s1082_s16 = int_to_ptr.vmem [resolvable:$true] %s599_s16 }
  0x2f   : > { %vm475_vm5 = vmand %vm472_vm3, %vm474_vm4  ;;  %p869_p6 = scmp.lt.s32.totalorder %s1082_s16, %s867_s24 }
  0x9c   : > { %v443_v4 = vpop.permute.xlu0 %442 }
  0x9d   : > { %v451_v6 = vpop.permute.xlu1 %450 }
  0xa0   : > { %v447_v7 = vpop.permute.xlu0 %446 }
  0xa1   : > { %v454_v8 = vsel %vm453_vm0, %v443_v4, %v447_v7 }
  0xa2   : > { %v456_v11 = vsel %vm455_vm1, %v454_v8, %v451_v6 }
  0xa3   : > { %458 = vst.msk [vmem:[#allocation2] sm:$0xf] %vm457_vm2, %v456_v11 }
  0xaa   : > { %v476_v12 = vld [vmem:[#allocation2] sm:$0xf] }
  0xab   : > { %v477_v13 = vsel %vm475_vm5, %v476_v12, 0.0 }
  0xac   : > { %478 = vst.msk [vmem:[#allocation2] sm:$0xf] %vm457_vm2, %v477_v13 }
  0xb3   : > { %v479_v17 = vld [vmem:[#allocation2] sm:$0xf] }
  0xb4   : > { %485 = vrot.lane.b32.xlu0 %v479_v17, %s952_s20  ;;  %v481_v18 = vrot.slane %v479_v17, 4 }
  0xb6   : > { %482 = vrot.lane.b32.xlu1 %v481_v18, %s953_s23  ;;  %s862_s23 = scalar_lea.vmem %s1082_s16, 128 }
  0xb7   : > { %p863_p3 = scmp.ne.s32.totalorder %s1082_s16, %s862_s23  ;;  %p870_p7 = scmp.lt.s32.totalorder %s868_s25, %s862_s23 }
  0xb8   : > { %576 = vperm.xlu0 %849, %v573_v19  }
  0xb9   : > { %p864_p4 = pnand %p863_p3, %p1039_p9  ;;  %p871_p8 = por %p870_p7, %p869_p6 }
  0xba   : > { %569 = vperm.xlu1 %848, %v566_v20  }
  0xbb   : > { %p865_p5 = pneg %p864_p4 }
  0xbd   : > { %p872_p10 = pnand %p871_p8, %p865_p5 }
 0x126   : > { %v486_v22 = vpop.permute.xlu0 %485 }
 0x128   : > { %v483_v21 = vpop.permute.xlu1 %482 }
 0x129   : > { %v488_v23 = vsel %vm487_vm7, %v479_v17, %v483_v21 }
 0x12a   : > { %v779_v24 = vpack.c.bf16 %v486_v22, %v488_v23 }
 0x12c   : > { %781 = vmatpush3.bf16.msk.msra.mxu0 %vm780_vm9, %v779_v24 }
 0x12f   : > { %776 = vmatmul.mubr.msk.f32.vlgmr.msra.gmra.mrb[0].mxu0 %vm490_vm10, %v489_v25 }
 0x137   : > { %v577_v28 = vpop.permute.xlu0 %576 }
 0x139   : > { %v570_v26 = vpop.permute.xlu1 %569 }
 0x202   : > { %v562_v27 = vpop.f32.mrb[0].mxu0 }
 0x203   : > { %v572_v29 = vmul.f32 %v570_v26, %v562_v27  ;;  %v777_v30 = vpop.f32.mrb[1].mxu0 }
 0x205   : > { %v579_v31 = vadd.f32 %v577_v28, %v572_v29 }
 0x207   : > { %v580_v32 = vmax.f32 %v579_v31, 0.0 }
 0x209   : > { %582 = vst.msk [vmem:[%s391_s14] sm:$0xff] %vm581_vm11, %v580_v32 }
 0x20a   : > { %875 = shalt.err (!%p872_p10)
}
 0x20b   : > { %s876_s26 = scalar_lea.hbm %s1080_s21, 128  ;;  %s880_s11 = scalar_lea.hbm %s1134_s7, 256 }
 0x20c   : > { %p877_p11 = scmp.ne.s32.totalorder %s1080_s21, %s876_s26  ;;  %p881_p1 = scmp.lt.u32.totalorder %s1080_s21, %s1134_s7 }
 0x20d   : > { %p882_p2 = scmp.lt.u32.totalorder %s880_s11, %s876_s26  ;;  %p884_p4 = scmp.lt.u32.totalorder %s876_s26, %s1080_s21 }
 0x20e   : > { %p878_p12 = pnand %p877_p11, %p1039_p9 }
 0x20f   : > { %p883_p3 = por %p882_p2, %p881_p1 }
 0x210   : > { %p879_p0 = pneg %p878_p12 }
 0x211   : > { %p885_p5 = por %p884_p4, %p883_p3 }
 0x213   : > { %p886_p6 = pnand %p885_p5, %p879_p0 }
 0x215   : > { %889 = shalt.err (!%p886_p6)
}
 0x216   : > { %782 = dma.vmem_to_hbm [thread:$0]  (%p1039_p9), %s1082_s16, 128, %s1080_s21, %s584_s22  }
 0x217 PF: > { %p788_p7 = scmp.ge.s32.totalorder %s942_s10, 2  ;;  %s611_s19 = sand.u32 1, %s922_s29  }
 0x218   : > { %s612_s20 = scalar_lea.sflag [#allocation6], %s611_s19 }
 0x219   : > { %p785_p8 = pnand %p788_p7, %p1046_p13 }
 0x21b   : > { %917 = dma.done.wait (!%p785_p8), %s612_s20, 128  }
 0x21c   : > { %919 = vsyncadd (!%p785_p8), %s612_s20, 4294967168  ;;  %s26_s10 = sadd.s32 1, %s942_s10   ;;  %s1137_s29 = smov %s926_s30 }
 0x21d   : > { %p23_p10 = scmp.ge.s32.totalorder %s26_s10, 4   ;;  %s1138_s30 = smov %s930_s0 }
 0x21e   : > { %s1139_s0 = smov %s1052_s18  ;;  %s1140_s8 = smov %s938_s9 }
 0x21f   : > { %s1141_s9 = smov %s1143_s13  ;;  %25 = sbr.rel (!%p23_p10) target bundleno = 19 (0x13), region = 98 }
 0x226   :  { %617 = vsyncpa [#allocation6], 1 }
 0x227   :  { %619 = vsyncpa [#allocation6 + $0x1], 1 }

</bundles_post_ra>
